<compile_context>
chip_gen: v6e
topology: v6e:2x2x1
jax: 0.10.0
libtpu: 0.0.40
codegen_flags: <defaults>
</compile_context>

<pallas_src>
import jax
import jax.numpy as jnp
from jax.experimental import pallas as pl
from jax.experimental.pallas import tpu as pltpu


def _round_up(x: int, m: int) -> int:
    return ((x + m - 1) // m) * m


def _embed_onehot_kernel(ids_ref, w_ref, out_ref):
    # ids_ref: (T, 1) int32 token ids for this chunk (pre-clamped to [0, V)).
    # w_ref  : (V, E_pad) embedding table, VMEM-resident across all grid steps.
    # out_ref: (T, E_pad) dense output tile.
    ids = ids_ref[...]                                        # (T, 1) int32
    T = ids.shape[0]
    V = w_ref.shape[0]
    vocab = jax.lax.broadcasted_iota(jnp.int32, (T, V), dimension=1)
    one_hot = (vocab == ids).astype(w_ref.dtype)              # (T, V), exact 0/1
    # HIGHEST precision keeps the f32 x f32 MXU matmul bit-exact for a one-hot
    # left operand (so the kernel reproduces the gather exactly).
    out_ref[...] = jnp.dot(
        one_hot,
        w_ref[...],
        preferred_element_type=jnp.float32,
        precision=jax.lax.Precision.HIGHEST,
    ).astype(out_ref.dtype)


def embedding_forward(token_ids: jax.Array, weight: jax.Array) -> jax.Array:
    """Embedding lookup: weight[token_ids].  token_ids: (B, S) int; weight: (V, E)."""
    B, S = token_ids.shape
    V, E = weight.shape
    N = B * S
    itemsize = jnp.dtype(weight.dtype).itemsize

    # Pad the embedding dim to a full lane width for dense (unmasked) stores.
    E_pad = _round_up(E, 128)
    if E_pad != E:
        weight = jnp.pad(weight, ((0, 0), (0, E_pad - E)))

    # Tokens per grid step: multiple of 8 sublanes, capped at 512.
    T = min(512, _round_up(max(N, 8), 8))
    N_pad = _round_up(N, T)
    num_chunks = N_pad // T

    flat_ids = token_ids.reshape(N).astype(jnp.int32)
    # PyTorch nn.Embedding raises IndexError for out-of-range ids; we clamp so
    # the kernel never reads out of bounds (documented precondition).
    flat_ids = jnp.clip(flat_ids, 0, V - 1)
    if N_pad != N:
        flat_ids = jnp.pad(flat_ids, (0, N_pad - N))
    ids_col = flat_ids.reshape(N_pad, 1)

    # VMEM budget: double-buffered table (resident), output tile and ids, plus
    # slack for the one-hot intermediate.
    table_bytes = V * E_pad * itemsize
    out_tile_bytes = T * E_pad * itemsize
    vmem_need = 2 * table_bytes + 2 * out_tile_bytes + 2 * (T * 4) + (4 << 20)
    vmem_limit = int(min(max(vmem_need, 16 << 20), 100 << 20))
    # TODO(synk): for very large vocabularies (table >> VMEM, esp. v7x's 64 MiB)
    # switch to an HBM-resident table with chunked manual row-DMA gather
    # (memory_space=pl.ANY + make_async_copy) instead of the one-hot matmul.

    cost = pl.CostEstimate(
        flops=2 * N_pad * V * E_pad,
        transcendentals=0,
        bytes_accessed=N_pad * 4 + table_bytes + N_pad * E_pad * itemsize,
    )

    out_flat = pl.pallas_call(
        _embed_onehot_kernel,
        out_shape=jax.ShapeDtypeStruct((N_pad, E_pad), weight.dtype),
        grid=(num_chunks,),
        in_specs=[
            # (T, 1) chunk of token ids per grid step.
            pl.BlockSpec((T, 1), lambda i: (i, 0)),
            # Full table, constant block index -> stays resident in VMEM.
            pl.BlockSpec((V, E_pad), lambda i: (0, 0)),
        ],
        out_specs=pl.BlockSpec((T, E_pad), lambda i: (i, 0)),
        compiler_params=pltpu.CompilerParams(
            dimension_semantics=("parallel",),
            vmem_limit_bytes=vmem_limit,
        ),
        cost_estimate=cost,
    )(ids_col, weight)

    return out_flat[:N, :E].reshape(B, S, E)


if __name__ == "__main__":
    # Small, deterministic synthetic setup (no Global.word2vec_mat / .pt files).
    vocab_size = 32
    embedding_size = 128
    batch = 2
    seq = 8

    key = jax.random.PRNGKey(0)
    k_w, k_ids = jax.random.split(key)

    # Deterministic "pretrained" embedding table and token ids.
    weight = jax.random.normal(k_w, (vocab_size, embedding_size), dtype=jnp.float32)
    token_ids = jax.random.randint(k_ids, (batch, seq), 0, vocab_size, dtype=jnp.int32)

    out = embedding_forward(token_ids, weight)
    out = jax.block_until_ready(out)

    # Correctness check against plain JAX gather (== torch nn.Embedding semantics).
    ref = weight[token_ids]
    assert out.shape == (batch, seq, embedding_size)
    assert out.dtype == jnp.float32
    max_err = float(jnp.max(jnp.abs(out - ref)))
    assert max_err <= 1e-6, f"max abs error {max_err}"

    print("KERNEL_OK")
</pallas_src>

<mosaic_0001>
module attributes {stable_mosaic.version = 11 : i64} {
  func.func @_embed_onehot_kernel(%arg0: i32, %arg1: memref<16x1xi32, #tpu.memory_space<vmem>>, %arg2: memref<32x128xf32, #tpu.memory_space<vmem>>, %arg3: memref<16x128xf32, #tpu.memory_space<vmem>>) attributes {dimension_semantics = [#tpu.dimension_semantics<parallel>], iteration_bounds = array<i64: 1>, scalar_prefetch = 0 : i64, scratch_operands = 0 : i64, tpu.core_type = #tpu.core_type<tc>, window_params = [{transform_indices = @transform_0, window_bounds = array<i64: 16, 1>}, {pipeline_mode = #tpu.pipeline_mode<synchronous>, transform_indices = @transform_1, window_bounds = array<i64: 32, 128>}, {transform_indices = @transform_2, window_bounds = array<i64: 16, 128>}]} {
    %c0 = arith.constant 0 : index
    %c0_0 = arith.constant 0 : index
    %0 = vector.load %arg1[%c0, %c0_0] : memref<16x1xi32, #tpu.memory_space<vmem>>, vector<16x1xi32>
    %1 = tpu.iota {dimensions = array<i32: 1>} : vector<16x32xi32>
    %2 = vector.broadcast %0 : vector<16x1xi32> to vector<16x32xi32>
    %3 = arith.cmpi eq, %1, %2 : vector<16x32xi32>
    %4 = arith.extui %3 : vector<16x32xi1> to vector<16x32xi32>
    %5 = arith.sitofp %4 : vector<16x32xi32> to vector<16x32xf32>
    %c0_1 = arith.constant 0 : index
    %c0_2 = arith.constant 0 : index
    %6 = vector.load %arg2[%c0_1, %c0_2] : memref<32x128xf32, #tpu.memory_space<vmem>>, vector<32x128xf32>
    %cst = arith.constant dense<0.000000e+00> : vector<16x128xf32>
    %7 = tpu.matmul %5, %6, %cst {dimension_numbers = #tpu.dot_dimension_numbers<[1], [0], [0], [1], [0, 0, 1, 1], [], []>, precision = #tpu.contract_precision<fp32>} : vector<16x32xf32>, vector<32x128xf32>, vector<16x128xf32> -> vector<16x128xf32>
    %c0_3 = arith.constant 0 : index
    %c0_4 = arith.constant 0 : index
    %8 = vector.load %arg3[%c0_3, %c0_4] : memref<16x128xf32, #tpu.memory_space<vmem>>, vector<16x128xf32>
    tpu.vector_store %arg3[%c0_3, %c0_4], %7 {strides = array<i32>} : memref<16x128xf32, #tpu.memory_space<vmem>>, vector<16x128xf32>,
    return
  }
  func.func @transform_0(%arg0: i32) -> (i32, i32) {
    %c0_i32 = arith.constant 0 : i32
    %c0_i32_0 = arith.constant 0 : i32
    return %arg0, %c0_i32 : i32, i32
  }
  func.func @transform_1(%arg0: i32) -> (i32, i32) {
    %c0_i32 = arith.constant 0 : i32
    %c0_i32_0 = arith.constant 0 : i32
    %c0_i32_1 = arith.constant 0 : i32
    return %c0_i32, %c0_i32_0 : i32, i32
  }
  func.func @transform_2(%arg0: i32) -> (i32, i32) {
    %c0_i32 = arith.constant 0 : i32
    %c0_i32_0 = arith.constant 0 : i32
    return %arg0, %c0_i32 : i32, i32
  }
}

</mosaic_0001>

<bundles_post_ra>
// kernel: tpu_custom_call.1
= control target key start
LH: loop header
LB: loop body
LE: loop exit
PB: predicated region body
PF: predicated region fallthrough
CT: control target
= control target key end

     0   :  { %7 = vsyncpa [#allocation3], 0  ;;  %s888_s0 = inlined_call_operand.vmem [shape: s32[16,1], index: 0, kind: input, shape index: {}]   ;;  %s889_s1 = inlined_call_operand.hbm [shape: f32[32,128], index: 1, kind: input, shape index: {}]   ;;  %s890_s2 = inlined_call_operand.hbm [shape: f32[16,128], index: 2, kind: output, shape index: {}]  }
   0x1   :  { %8 = vsyncpa [#allocation4], 0  ;;  %s761_s9 = smov [#allocation2]  }
   0x2   :  { %s16_s10 = sshll.u32 %s761_s9, 4  ;;  %s17_s10 = int_to_ptr.vmem [resolvable:$true] %s16_s10 }
   0x3   :  { %s725_s11 = scalar_lea.vmem %s17_s10, 512  ;;  %p730_p1 = scmp.lt.s32.totalorder %s17_s10, %s17_s10 }
   0x4   :  { %p726_p0 = scmp.ne.s32.totalorder %s17_s10, %s725_s11  ;;  %p731_p2 = scmp.lt.s32.totalorder %s725_s11, %s725_s11 }
   0x6   :  { %p732_p3 = por %p731_p2, %p730_p1 }
   0x8   :  { %p733_p4 = pnand %p732_p3, %p726_p0 }
   0xa   :  { %736 = shalt.err (!%p733_p4)
}
   0xb   :  { %s762_s12 = smov 128   ;;  %s763_s13 = smov 8  }
   0xc   :  { %22 = dma.hbm_to_vmem [thread:$0]  %s889_s1, 512, %s17_s10, [#allocation3], %s762_s12, %s762_s12, %s763_s13  }
   0xd   :  { %757 = dma.done.wait [#allocation3], 512  }
   0xe   :  { %758 = vsyncadd [#allocation3], 4294966784  ;;  %v764_v0 = vmov 0   ;;  %v26_v1 = vld [vmem:[%s888_s0] sm:$0xff]  ;;  %v45_v2 = vld [vmem:[#allocation2 + $0x18] sm:$0xff]  ;;  %v28_v27 = vlaneseq  ;;  %vm46_vm0 = vcmask 261120  }
   0xf   :  { %716 = vset.pattern.permute.xlu0 %v764_v0  ;;  %v791_v3 = vand.u32 4294901760, %v45_v2  ;;  %v44_v4 = vld [vmem:[#allocation2 + $0x10] sm:$0xff]  ;;  %v43_v5 = vld [vmem:[#allocation2 + $0x8] sm:$0xff]  ;;  %v42_v6 = vld [vmem:[#allocation2] sm:$0xff]  ;;  %v765_v30 = vmov 0.0  }
  0x10   :  { %31 = vperm.xlu0 %716, %v26_v1   ;;  %v27_v7 = vld [vmem:[%s888_s0 + $0x8] sm:$0xff]  ;;  %v796_v8 = vand.u32 4294901760, %v44_v4  ;;  %v798_v9 = vand.u32 4294901760, %v43_v5  ;;  %v800_v10 = vand.u32 4294901760, %v42_v6  ;;  %v29_v28 = vand.u32 127, %v28_v27  ;;  %s766_s0 = smov [#allocation5]  }
  0x11   :  { %v803_v11 = vsub.f32 %v45_v2, %v791_v3  ;;  %644 = vmatprep.subr.mxu0 %v791_v3  ;;  %s588_s1 = sshll.u32 %s766_s0, 4  ;;  %s589_s1 = int_to_ptr.vmem [resolvable:$true] %s588_s1 }
  0x12   :  { %v807_v12 = vsub.f32 %v44_v4, %v796_v8  ;;  %v810_v13 = vsub.f32 %v43_v5, %v798_v9  ;;  %v813_v14 = vsub.f32 %v42_v6, %v800_v10  ;;  %645 = vmatpush3.msra.mxu0 %v791_v3  ;;  %s737_s20 = scalar_lea.vmem %s589_s1, 256  ;;  %p742_p6 = scmp.lt.s32.totalorder %s589_s1, %s589_s1 }
  0x13   :  { %v817_v15 = vand.u32 4294901760, %v803_v11  ;;  %646 = vmatprep.subr.mxu0 %v796_v8  ;;  %p738_p5 = scmp.ne.s32.totalorder %s589_s1, %s737_s20  ;;  %p743_p7 = scmp.lt.s32.totalorder %s737_s20, %s737_s20 }
  0x14   :  { %34 = vperm.xlu0 %716, %v27_v7   ;;  %v821_v16 = vand.u32 4294901760, %v807_v12  ;;  %v824_v17 = vand.u32 4294901760, %v810_v13  ;;  %v827_v18 = vand.u32 4294901760, %v813_v14  ;;  %647 = vmatpush3.msra.mxu0 %v796_v8 }
  0x15   :  { %v170_v19 = vsub.f32 %v803_v11, %v817_v15  ;;  %648 = vmatprep.subr.mxu0 %v798_v9  ;;  %p744_p8 = por %p743_p7, %p742_p6 }
  0x16   :  { %v177_v20 = vsub.f32 %v807_v12, %v821_v16  ;;  %v184_v21 = vsub.f32 %v810_v13, %v824_v17  ;;  %649 = vmatpush3.msra.mxu0 %v798_v9  ;;  %v191_v23 = vsub.f32 %v813_v14, %v827_v18 }
  0x17   :  { %v171_v22 = vand.u32 4294901760, %v170_v19  ;;  %650 = vmatprep.subr.mxu0 %v800_v10  ;;  %p745_p9 = pnand %p744_p8, %p738_p5 }
  0x18   :  { %v178_v24 = vand.u32 4294901760, %v177_v20  ;;  %651 = vmatpush3.msra.mxu0 %v800_v10  ;;  %v185_v25 = vand.u32 4294901760, %v184_v21  ;;  %v192_v26 = vand.u32 4294901760, %v191_v23 }
  0x19   :  { %655 = vmatprep.subr.mxu1 %v171_v22  ;;  %666 = vmatprep.subr.mxu0 %v803_v11 }
  0x1a   :  { %656 = vmatpush3.msra.mxu1 %v171_v22 }
  0x1b   :  { %657 = vmatprep.subr.mxu1 %v178_v24 }
  0x1c   :  { %658 = vmatpush3.msra.mxu1 %v178_v24 }
  0x1d   :  { %659 = vmatprep.subr.mxu1 %v185_v25 }
  0x1e   :  { %660 = vmatpush3.msra.mxu1 %v185_v25 }
  0x1f   :  { %661 = vmatprep.subr.mxu1 %v192_v26 }
  0x20   :  { %662 = vmatpush3.msra.mxu1 %v192_v26 }
  0x21   :  { %677 = vmatprep.subr.mxu1 %v791_v3 }
  0x8b   :  { %v32_v29 = vpop.permute.xlu0 %31 }
  0x8c   :  { %vm36_vm1 = vcmp.eq.s32.totalorder %v29_v28, %v32_v29 }
  0x8d   :  { %v600_v31 = vsel %vm36_vm1, 1.0, %v765_v30 }
  0x8e   :  { %v48_v32 = vsel %vm46_vm0, %v600_v31, 0  ;;  %663 = vmatprep.mubr.msk.f32.mxu1 %vm46_vm0, %v600_v31 }
  0x8f   :  { %v123_v33 = vsub.f32 %v48_v32, %v48_v32  ;;  %v35_v34 = vpop.permute.xlu0 %34 }
  0x90   :  { %vm37_vm2 = vcmp.eq.s32.totalorder %v29_v28, %v35_v34 }
  0x91   :  { %v601_v35 = vsel %vm37_vm2, 1.0, %v765_v30  ;;  %v124_v36 = vand.u32 4294901760, %v123_v33 }
  0x92   :  { %v51_v37 = vsel %vm46_vm0, %v601_v35, 0  ;;  %664 = vmatmul.mubr.msk.f32.vlgmr.msra.gmra.mxu1 %vm46_vm0, %v601_v35 }
  0x93   :  { %v133_v38 = vsub.f32 %v51_v37, %v51_v37  ;;  %678 = vmatpush3.msra.mxu1 %v791_v3  ;;  %685 = vmatprep.mubr.f32.mxu1 %v124_v36  ;;  %v125_v39 = vsub.f32 %v123_v33, %v124_v36 }
  0x94   :  { %679 = vmatprep.subr.mxu1 %v796_v8 }
  0x95   :  { %680 = vmatpush3.msra.mxu1 %v796_v8  ;;  %v126_v40 = vand.u32 4294901760, %v125_v39  ;;  %v134_v41 = vand.u32 4294901760, %v133_v38 }
  0x96   :  { %681 = vmatprep.subr.mxu1 %v798_v9 }
  0x97   :  { %682 = vmatpush3.msra.mxu1 %v798_v9  ;;  %652 = vmatprep.mubr.f32.mxu0 %v126_v40  ;;  %v135_v42 = vsub.f32 %v133_v38, %v134_v41 }
  0x98   :  { %683 = vmatprep.subr.mxu1 %v800_v10 }
  0x99   :  { %684 = vmatpush3.msra.mxu1 %v800_v10  ;;  %v136_v43 = vand.u32 4294901760, %v135_v42 }
  0x9a   :  { %686 = vmatmul.mubr.f32.vlgmr.msra.gmra.mxu1 %v134_v41  ;;  %699 = vmatprep.subr.mxu1 %v791_v3 }
  0x9b   :  { %700 = vmatpush3.msra.mxu1 %v791_v3  ;;  %707 = vmatprep.mubr.msk.f32.mxu1 %vm46_vm0, %v600_v31 }
  0x9c   :  { %653 = vmatmul.mubr.f32.vlgmr.msra.gmra.mxu0 %v136_v43  ;;  %701 = vmatprep.subr.mxu1 %v796_v8 }
  0x9d   :  { %667 = vmatpush3.msra.mxu0 %v803_v11  ;;  %674 = vmatprep.mubr.f32.mxu0 %v123_v33 }
  0x9e   :  { %668 = vmatprep.subr.mxu0 %v807_v12  ;;  %702 = vmatpush3.msra.mxu1 %v796_v8 }
  0x9f   :  { %669 = vmatpush3.msra.mxu0 %v807_v12  ;;  %703 = vmatprep.subr.mxu1 %v798_v9 }
  0xa0   :  { %670 = vmatprep.subr.mxu0 %v810_v13  ;;  %704 = vmatpush3.msra.mxu1 %v798_v9 }
  0xa1   :  { %671 = vmatpush3.msra.mxu0 %v810_v13  ;;  %705 = vmatprep.subr.mxu1 %v800_v10 }
  0xa2   :  { %672 = vmatprep.subr.mxu0 %v813_v14  ;;  %706 = vmatpush3.msra.mxu1 %v800_v10 }
  0xa3   :  { %673 = vmatpush3.msra.mxu0 %v813_v14  ;;  %708 = vmatmul.mubr.msk.f32.vlgmr.msra.gmra.mxu1 %vm46_vm0, %v601_v35 }
  0xa4   :  { %675 = vmatmul.mubr.f32.vlgmr.msra.gmra.mxu0 %v133_v38  ;;  %688 = vmatprep.subr.mxu0 %v817_v15 }
  0xa5   :  { %689 = vmatpush3.msra.mxu0 %v817_v15  ;;  %696 = vmatprep.mubr.msk.f32.mxu0 %vm46_vm0, %v600_v31 }
  0xa6   :  { %690 = vmatprep.subr.mxu0 %v821_v16 }
  0xa7   :  { %691 = vmatpush3.msra.mxu0 %v821_v16 }
  0xa8   :  { %692 = vmatprep.subr.mxu0 %v824_v17 }
  0xa9   :  { %693 = vmatpush3.msra.mxu0 %v824_v17 }
  0xaa   :  { %694 = vmatprep.subr.mxu0 %v827_v18 }
  0xab   :  { %695 = vmatpush3.msra.mxu0 %v827_v18 }
  0xac   :  { %697 = vmatmul.mubr.msk.f32.vlgmr.msra.gmra.mxu0 %vm46_vm0, %v601_v35 }
 0x152   :  { %v665_v45 = vpop.f32.mrf.mxu1 }
 0x154   :  { %v229_v47 = vpop.f32.mrf.mxu1 }
 0x15a   :  { %v687_v50 = vpop.f32.mrf.mxu1 }
 0x15c   :  { %v654_v44 = vpop.f32.mrf.mxu0  ;;  %v399_v55 = vpop.f32.mrf.mxu1 }
 0x15d   :  { %v236_v49 = vadd.f32 %v665_v45, %v654_v44 }
 0x15e   :  { %v128_v46 = vpop.f32.mrf.mxu0 }
 0x15f   :  { %v230_v52 = vadd.f32 %v229_v47, %v128_v46 }
 0x163   :  { %v709_v57 = vpop.f32.mrf.mxu1 }
 0x164   :  { %v676_v48 = vpop.f32.mrf.mxu0 }
 0x165   :  { %v323_v53 = vadd.f32 %v676_v48, %v236_v49  ;;  %v571_v0 = vpop.f32.mrf.mxu1 }
 0x166   :  { %v315_v51 = vpop.f32.mrf.mxu0 }
 0x167   :  { %v316_v54 = vadd.f32 %v315_v51, %v230_v52  ;;  %v408_v56 = vadd.f32 %v687_v50, %v323_v53 }
 0x169   :  { %v400_v60 = vadd.f32 %v399_v55, %v316_v54 }
 0x16c   :  { %v698_v58 = vpop.f32.mrf.mxu0 }
 0x16d   :  { %v497_v59 = vadd.f32 %v698_v58, %v408_v56 }
 0x16e   :  { %v490_v61 = vpop.f32.mrf.mxu0 }
 0x16f   :  { %v578_v62 = vadd.f32 %v709_v57, %v497_v59  ;;  %v491_v63 = vadd.f32 %v490_v61, %v400_v60 }
 0x171   :  { %582 = vst [vmem:[#allocation5 + $0x8] sm:$0xff] %v578_v62  ;;  %v572_v1 = vadd.f32 %v571_v0, %v491_v63 }
 0x173   :  { %581 = vst [vmem:[#allocation5] sm:$0xff] %v572_v1 }
 0x174   :  { %748 = shalt.err (!%p745_p9)
}
 0x175   :  { %594 = dma.vmem_to_hbm [thread:$0]  %s589_s1, 256, %s890_s2, [#allocation4], %s762_s12, %s762_s12, %s763_s13  }
 0x176   :  { %759 = dma.done.wait [#allocation4], 256  }
 0x177   :  { %760 = vsyncadd [#allocation4], 4294967040 }
 0x178   :  { %598 = vsyncpa [#allocation3], 1 }
 0x179   :  { %599 = vsyncpa [#allocation4], 1 }

</bundles_post_ra>
